<compile_context>
chip_gen: v5e
topology: v5e:2x2
jax: 0.10.0
libtpu: 0.0.40
codegen_flags: <defaults>
</compile_context>

<pallas_src>
import functools

import jax
import jax.numpy as jnp
from jax.experimental import pallas as pl
from jax.experimental.pallas import tpu as pltpu

LN_EPS = 1e-5  # torch.nn.LayerNorm default


def _round_up(v, m):
    return ((v + m - 1) // m) * m


def _layernorm(y, gamma, beta, h_true, h_pad):
    """Centered-variance LayerNorm over the true hidden width.

    y: (tm, Hp) f32 whose columns >= h_true are exactly zero (zero-padded
    weights).  Centered form is numerically safer than E[y^2] - E[y]^2; each
    padded column contributes exactly mean^2 to the centered sum of squares,
    which is removed analytically so statistics match the unpadded LayerNorm.
    """
    inv_h = 1.0 / h_true
    mean = jnp.sum(y, axis=-1, keepdims=True) * inv_h
    d = y - mean
    ssq = jnp.sum(d * d, axis=-1, keepdims=True)
    if h_pad > h_true:
        ssq = ssq - (h_pad - h_true) * (mean * mean)
    var = jnp.maximum(ssq * inv_h, 0.0)
    inv = jax.lax.rsqrt(var + LN_EPS)          # EUP slot, hidden under MXU work
    # gamma/beta are zero in padded columns -> padded outputs stay exactly 0.
    return d * inv * gamma + beta


def termination_decoder_kernel(
    x_ref,    # (tm, Hp)  bf16 input rows (pipelined)
    w1_ref,   # (Hp, Hp)  bf16, VMEM-resident (single copy)
    g1_ref,   # (1, Hp)   f32, resident
    b1_ref,   # (1, Hp)   f32, resident
    w2_ref,   # (Hp, Hp)  bf16, resident
    g2_ref,   # (1, Hp)   f32, resident
    b2_ref,   # (1, Hp)   f32, resident
    w3_ref,   # (1, Hp)   f32 head weight row, resident
    b3_ref,   # (1,)      f32 head bias, SMEM scalar
    o_ref,    # (tm, 1)   output logits column
    *,
    h_true,
    h_pad,
):
    x = x_ref[...].astype(jnp.bfloat16)

    # --- backbone block 1: Linear(no bias) -> LayerNorm -> ReLU -------------
    y = jnp.dot(x, w1_ref[...], preferred_element_type=jnp.float32)
    y = _layernorm(y, g1_ref[...], b1_ref[...], h_true, h_pad)
    y = jnp.maximum(y, 0.0)

    # --- backbone block 2: Linear(no bias) -> LayerNorm -> ReLU -------------
    y = jnp.dot(y.astype(jnp.bfloat16), w2_ref[...],
                preferred_element_type=jnp.float32)
    y = _layernorm(y, g2_ref[...], b2_ref[...], h_true, h_pad)
    y = jnp.maximum(y, 0.0)

    # --- head: Linear(H, 1) + bias -------------------------------------------
    # Broadcast-multiply + lane reduce on the VPU/XLU (no trans-B matmul, no
    # full-tile transpose).  Padded columns of y and w3 are zero, so the sum
    # over Hp equals the sum over the true width.
    t = jnp.sum(y * w3_ref[...], axis=-1, keepdims=True) + b3_ref[0]
    o_ref[...] = t.astype(o_ref.dtype)


@functools.partial(jax.jit, static_argnames=("tm",))
def termination_decoder(feat, params, tm=None):
    """feat: (B, L, H) -> termination logits (B, L)."""
    B, L, H = feat.shape
    M = B * L
    w1, g1, b1, w2, g2, b2, w3, b3 = params

    # ---- lane alignment: pad hidden dim to a multiple of 128 ---------------
    Hp = _round_up(H, 128)
    x = feat.reshape(M, H)
    if Hp != H:
        cp = Hp - H
        x = jnp.pad(x, ((0, 0), (0, cp)))
        w1 = jnp.pad(w1, ((0, cp), (0, cp)))
        w2 = jnp.pad(w2, ((0, cp), (0, cp)))
        w3 = jnp.pad(w3, ((0, cp), (0, 0)))
        g1 = jnp.pad(g1, ((0, 0), (0, cp)))
        b1 = jnp.pad(b1, ((0, 0), (0, cp)))
        g2 = jnp.pad(g2, ((0, 0), (0, cp)))
        b2 = jnp.pad(b2, ((0, 0), (0, cp)))

    # bf16 activations for the MXU: halves x HBM traffic and x-tile VMEM
    # (the kernel would truncate to bf16 anyway); fuses with the pad above.
    x = x.astype(jnp.bfloat16)

    # ---- generation-aware budgets ------------------------------------------
    try:
        vmem_phys = int(pltpu.get_tpu_info().vmem_capacity_bytes)
    except Exception:
        vmem_phys = 64 * 1024 * 1024   # conservative: v7x per-TensorCore size

    # Row tile: bigger on 128-MiB parts (v5e/v6e), 256 on v7x (64 MiB/TC).
    if tm is None:
        tm = 512 if vmem_phys >= 100 * 1024 * 1024 else 256
    # No wrapper-side row padding: ragged last block is row-independent and
    # the overrun rows are sliced off below (they may hold garbage, but are
    # never returned and cannot contaminate valid rows).
    tm = _round_up(max(16, min(tm, _round_up(M, 16))), 16)
    grid_m = pl.cdiv(M, tm)
    Mp = grid_m * tm

    # ---- weight/param dtypes -------------------------------------------------
    bf = jnp.bfloat16
    w1b = w1.astype(bf)
    w2b = w2.astype(bf)
    w3r = w3.reshape(1, Hp).astype(jnp.float32)   # head row: used on the VPU
    g1 = g1.reshape(1, Hp).astype(jnp.float32)
    b1 = b1.reshape(1, Hp).astype(jnp.float32)
    g2 = g2.reshape(1, Hp).astype(jnp.float32)
    b2 = b2.reshape(1, Hp).astype(jnp.float32)
    b3s = b3.reshape(1).astype(jnp.float32)

    # ---- VMEM estimate (per TensorCore: each v7x TC keeps its own copy) ----
    est = (
        2 * Hp * Hp * 2            # w1 + w2 resident bf16 (single-buffered)
        + 5 * Hp * 4               # g1, b1, g2, b2, w3 rows (f32)
        + 2 * tm * Hp * 2          # x tile, double-buffered bf16
        + 2 * tm * 128 * 4         # (tm, 1) out tile (lane-padded), double-buffered
        + 3 * tm * Hp * 4          # live f32 intermediates (matmul acc / LN temps)
    )
    vmem_cap = int(0.85 * vmem_phys)
    vmem_limit = min(max(int(est * 1.25), 32 * 1024 * 1024), vmem_cap)

    cost = pl.CostEstimate(
        flops=int(4 * M * Hp * Hp + 2 * M * Hp),
        transcendentals=int(2 * M),
        bytes_accessed=int(M * Hp * 2 + 2 * Hp * Hp * 2 + 5 * Hp * 4
                           + M * jnp.dtype(feat.dtype).itemsize),
    )

    # Whole-array VMEM residency (no blocking -> single buffer, one DMA).
    resident = pl.BlockSpec(memory_space=pltpu.MemorySpace.VMEM)

    out = pl.pallas_call(
        functools.partial(termination_decoder_kernel, h_true=H, h_pad=Hp),
        out_shape=jax.ShapeDtypeStruct((Mp, 1), feat.dtype),
        grid_spec=pltpu.PrefetchScalarGridSpec(
            num_scalar_prefetch=0,
            grid=(grid_m,),
            in_specs=[
                pl.BlockSpec((tm, Hp), lambda i: (i, 0)),           # x rows
                resident,                                            # w1
                resident,                                            # g1
                resident,                                            # b1
                resident,                                            # w2
                resident,                                            # g2
                resident,                                            # b2
                resident,                                            # w3 row
                pl.BlockSpec(memory_space=pltpu.MemorySpace.SMEM),   # b3 scalar
            ],
            out_specs=pl.BlockSpec((tm, 1), lambda i: (i, 0)),
        ),
        compiler_params=pltpu.CompilerParams(
            dimension_semantics=("parallel",),   # shards rows across v7x's 2 TCs
            vmem_limit_bytes=vmem_limit,
        ),
        cost_estimate=cost,
    )(x, w1b, g1, b1, w2b, g2, b2, w3r, b3s)

    return out.reshape(Mp)[:M].reshape(B, L)


def init_params(key, hidden):
    """Deterministic synthetic parameters matching the PyTorch module shapes."""
    k1, k2, k3, k4 = jax.random.split(key, 4)
    scale = 1.0 / jnp.sqrt(hidden)
    w1 = jax.random.uniform(k1, (hidden, hidden), jnp.float32, -scale, scale)
    g1 = jnp.ones((1, hidden), jnp.float32)
    b1 = jnp.zeros((1, hidden), jnp.float32)
    w2 = jax.random.uniform(k2, (hidden, hidden), jnp.float32, -scale, scale)
    g2 = jnp.ones((1, hidden), jnp.float32)
    b2 = jnp.zeros((1, hidden), jnp.float32)
    w3 = jax.random.uniform(k3, (hidden, 1), jnp.float32, -scale, scale)
    b3 = jax.random.uniform(k4, (1, 1), jnp.float32, -scale, scale)
    return (w1, g1, b1, w2, g2, b2, w3, b3)


def reference(feat, params):
    """Pure-JAX f32 reference mirroring the PyTorch forward."""
    w1, g1, b1, w2, g2, b2, w3, b3 = params
    x = feat.astype(jnp.float32)

    def ln(v, g, b):
        m = jnp.mean(v, axis=-1, keepdims=True)
        var = jnp.mean((v - m) ** 2, axis=-1, keepdims=True)
        return (v - m) / jnp.sqrt(var + LN_EPS) * g + b

    y = jnp.maximum(ln(x @ w1, g1[0], b1[0]), 0.0)
    y = jnp.maximum(ln(y @ w2, g2[0], b2[0]), 0.0)
    t = y @ w3 + b3[0]
    return t[..., 0]


if __name__ == "__main__":
    key = jax.random.PRNGKey(0)

    # --- case 1: small, 128-padded hidden dim, single grid step -------------
    B, L, H = 2, 8, 32          # batch, sequence, transformer_hidden_dim
    kf, kp, kf2, kp2 = jax.random.split(key, 4)
    feat = jax.random.normal(kf, (B, L, H), jnp.float32)
    params = init_params(kp, H)

    out = jax.block_until_ready(termination_decoder(feat, params))
    ref = reference(feat, params)
    assert out.shape == (B, L), out.shape
    err = float(jnp.max(jnp.abs(out - ref)))
    assert err < 1e-1, err      # bf16 MXU operands vs pure-f32 reference

    # --- case 2: non-aligned H and a ragged last row block ------------------
    B2, L2, H2 = 3, 7, 40       # M=21 rows, tm=16 -> grid of 2, ragged tail
    feat2 = jax.random.normal(kf2, (B2, L2, H2), jnp.float32)
    params2 = init_params(kp2, H2)

    out2 = jax.block_until_ready(termination_decoder(feat2, params2, tm=16))
    ref2 = reference(feat2, params2)
    assert out2.shape == (B2, L2), out2.shape
    err2 = float(jnp.max(jnp.abs(out2 - ref2)))
    assert err2 < 1e-1, err2

    print("KERNEL_OK")
</pallas_src>

<mosaic_0001>
module attributes {stable_mosaic.version = 11 : i64} {
  func.func @termination_decoder_kernel(%arg0: i32, %arg1: memref<16x128xbf16, #tpu.memory_space<vmem>>, %arg2: memref<128x128xbf16, #tpu.memory_space<vmem>>, %arg3: memref<1x128xf32, #tpu.memory_space<vmem>>, %arg4: memref<1x128xf32, #tpu.memory_space<vmem>>, %arg5: memref<128x128xbf16, #tpu.memory_space<vmem>>, %arg6: memref<1x128xf32, #tpu.memory_space<vmem>>, %arg7: memref<1x128xf32, #tpu.memory_space<vmem>>, %arg8: memref<1x128xf32, #tpu.memory_space<vmem>>, %arg9: memref<1xf32, #tpu.memory_space<smem>>, %arg10: memref<16x1xf32, #tpu.memory_space<vmem>>) attributes {dimension_semantics = [#tpu.dimension_semantics<parallel>], iteration_bounds = array<i64: 1>, scalar_prefetch = 0 : i64, scratch_operands = 0 : i64, tpu.core_type = #tpu.core_type<tc>, window_params = [{transform_indices = @transform_0, window_bounds = array<i64: 16, 128>}, {pipeline_mode = #tpu.pipeline_mode<synchronous>, transform_indices = @transform_1, window_bounds = array<i64: 128, 128>}, {pipeline_mode = #tpu.pipeline_mode<synchronous>, transform_indices = @transform_2, window_bounds = array<i64: 1, 128>}, {pipeline_mode = #tpu.pipeline_mode<synchronous>, transform_indices = @transform_3, window_bounds = array<i64: 1, 128>}, {pipeline_mode = #tpu.pipeline_mode<synchronous>, transform_indices = @transform_4, window_bounds = array<i64: 128, 128>}, {pipeline_mode = #tpu.pipeline_mode<synchronous>, transform_indices = @transform_5, window_bounds = array<i64: 1, 128>}, {pipeline_mode = #tpu.pipeline_mode<synchronous>, transform_indices = @transform_6, window_bounds = array<i64: 1, 128>}, {pipeline_mode = #tpu.pipeline_mode<synchronous>, transform_indices = @transform_7, window_bounds = array<i64: 1, 128>}, {transform_indices = @transform_8, window_bounds = array<i64: 1>}, {transform_indices = @transform_9, window_bounds = array<i64: 16, 1>}]} {
    %c0 = arith.constant 0 : index
    %c0_0 = arith.constant 0 : index
    %0 = vector.load %arg1[%c0, %c0_0] : memref<16x128xbf16, #tpu.memory_space<vmem>>, vector<16x128xbf16>
    %c0_1 = arith.constant 0 : index
    %c0_2 = arith.constant 0 : index
    %1 = vector.load %arg2[%c0_1, %c0_2] : memref<128x128xbf16, #tpu.memory_space<vmem>>, vector<128x128xbf16>
    %cst = arith.constant dense<0.000000e+00> : vector<16x128xf32>
    %2 = tpu.matmul %0, %1, %cst {dimension_numbers = #tpu.dot_dimension_numbers<[1], [0], [0], [1], [0, 0, 1, 1], [], []>} : vector<16x128xbf16>, vector<128x128xbf16>, vector<16x128xf32> -> vector<16x128xf32>
    %c0_3 = arith.constant 0 : index
    %c0_4 = arith.constant 0 : index
    %3 = vector.load %arg3[%c0_3, %c0_4] : memref<1x128xf32, #tpu.memory_space<vmem>>, vector<1x128xf32>
    %c0_5 = arith.constant 0 : index
    %c0_6 = arith.constant 0 : index
    %4 = vector.load %arg4[%c0_5, %c0_6] : memref<1x128xf32, #tpu.memory_space<vmem>>, vector<1x128xf32>
    %cst_7 = arith.constant dense<0.000000e+00> : vector<16xf32>
    %5 = vector.multi_reduction <add>, %2, %cst_7 [1] : vector<16x128xf32> to vector<16xf32>
    %6 = vector.shape_cast %5 : vector<16xf32> to vector<16x1xf32>
    %cst_8 = arith.constant 3.125000e-02 : f32
    %7 = vector.broadcast %cst_8 : f32 to vector<16x1xf32>
    %8 = arith.mulf %6, %7 : vector<16x1xf32>
    %9 = vector.broadcast %8 : vector<16x1xf32> to vector<16x128xf32>
    %10 = arith.subf %2, %9 : vector<16x128xf32>
    %11 = arith.mulf %10, %10 : vector<16x128xf32>
    %cst_9 = arith.constant dense<0.000000e+00> : vector<16xf32>
    %12 = vector.multi_reduction <add>, %11, %cst_9 [1] : vector<16x128xf32> to vector<16xf32>
    %13 = vector.shape_cast %12 : vector<16xf32> to vector<16x1xf32>
    %14 = arith.mulf %8, %8 : vector<16x1xf32>
    %cst_10 = arith.constant 9.600000e+01 : f32
    %15 = vector.broadcast %cst_10 : f32 to vector<16x1xf32>
    %16 = arith.mulf %15, %14 : vector<16x1xf32>
    %17 = arith.subf %13, %16 : vector<16x1xf32>
    %cst_11 = arith.constant 3.125000e-02 : f32
    %18 = vector.broadcast %cst_11 : f32 to vector<16x1xf32>
    %19 = arith.mulf %17, %18 : vector<16x1xf32>
    %cst_12 = arith.constant 0.000000e+00 : f32
    %20 = vector.broadcast %cst_12 : f32 to vector<16x1xf32>
    %21 = arith.maximumf %19, %20 : vector<16x1xf32>
    %cst_13 = arith.constant 9.99999974E-6 : f32
    %22 = vector.broadcast %cst_13 : f32 to vector<16x1xf32>
    %23 = arith.addf %21, %22 : vector<16x1xf32>
    %24 = math.rsqrt %23 : vector<16x1xf32>
    %25 = vector.broadcast %24 : vector<16x1xf32> to vector<16x128xf32>
    %26 = arith.mulf %10, %25 : vector<16x128xf32>
    %27 = vector.broadcast %3 : vector<1x128xf32> to vector<16x128xf32>
    %28 = arith.mulf %26, %27 : vector<16x128xf32>
    %29 = vector.broadcast %4 : vector<1x128xf32> to vector<16x128xf32>
    %30 = arith.addf %28, %29 : vector<16x128xf32>
    %cst_14 = arith.constant 0.000000e+00 : f32
    %31 = vector.broadcast %cst_14 : f32 to vector<16x128xf32>
    %32 = arith.maximumf %30, %31 : vector<16x128xf32>
    %33 = arith.truncf %32 : vector<16x128xf32> to vector<16x128xbf16>
    %c0_15 = arith.constant 0 : index
    %c0_16 = arith.constant 0 : index
    %34 = vector.load %arg5[%c0_15, %c0_16] : memref<128x128xbf16, #tpu.memory_space<vmem>>, vector<128x128xbf16>
    %cst_17 = arith.constant dense<0.000000e+00> : vector<16x128xf32>
    %35 = tpu.matmul %33, %34, %cst_17 {dimension_numbers = #tpu.dot_dimension_numbers<[1], [0], [0], [1], [0, 0, 1, 1], [], []>} : vector<16x128xbf16>, vector<128x128xbf16>, vector<16x128xf32> -> vector<16x128xf32>
    %c0_18 = arith.constant 0 : index
    %c0_19 = arith.constant 0 : index
    %36 = vector.load %arg6[%c0_18, %c0_19] : memref<1x128xf32, #tpu.memory_space<vmem>>, vector<1x128xf32>
    %c0_20 = arith.constant 0 : index
    %c0_21 = arith.constant 0 : index
    %37 = vector.load %arg7[%c0_20, %c0_21] : memref<1x128xf32, #tpu.memory_space<vmem>>, vector<1x128xf32>
    %cst_22 = arith.constant dense<0.000000e+00> : vector<16xf32>
    %38 = vector.multi_reduction <add>, %35, %cst_22 [1] : vector<16x128xf32> to vector<16xf32>
    %39 = vector.shape_cast %38 : vector<16xf32> to vector<16x1xf32>
    %cst_23 = arith.constant 3.125000e-02 : f32
    %40 = vector.broadcast %cst_23 : f32 to vector<16x1xf32>
    %41 = arith.mulf %39, %40 : vector<16x1xf32>
    %42 = vector.broadcast %41 : vector<16x1xf32> to vector<16x128xf32>
    %43 = arith.subf %35, %42 : vector<16x128xf32>
    %44 = arith.mulf %43, %43 : vector<16x128xf32>
    %cst_24 = arith.constant dense<0.000000e+00> : vector<16xf32>
    %45 = vector.multi_reduction <add>, %44, %cst_24 [1] : vector<16x128xf32> to vector<16xf32>
    %46 = vector.shape_cast %45 : vector<16xf32> to vector<16x1xf32>
    %47 = arith.mulf %41, %41 : vector<16x1xf32>
    %cst_25 = arith.constant 9.600000e+01 : f32
    %48 = vector.broadcast %cst_25 : f32 to vector<16x1xf32>
    %49 = arith.mulf %48, %47 : vector<16x1xf32>
    %50 = arith.subf %46, %49 : vector<16x1xf32>
    %cst_26 = arith.constant 3.125000e-02 : f32
    %51 = vector.broadcast %cst_26 : f32 to vector<16x1xf32>
    %52 = arith.mulf %50, %51 : vector<16x1xf32>
    %cst_27 = arith.constant 0.000000e+00 : f32
    %53 = vector.broadcast %cst_27 : f32 to vector<16x1xf32>
    %54 = arith.maximumf %52, %53 : vector<16x1xf32>
    %cst_28 = arith.constant 9.99999974E-6 : f32
    %55 = vector.broadcast %cst_28 : f32 to vector<16x1xf32>
    %56 = arith.addf %54, %55 : vector<16x1xf32>
    %57 = math.rsqrt %56 : vector<16x1xf32>
    %58 = vector.broadcast %57 : vector<16x1xf32> to vector<16x128xf32>
    %59 = arith.mulf %43, %58 : vector<16x128xf32>
    %60 = vector.broadcast %36 : vector<1x128xf32> to vector<16x128xf32>
    %61 = arith.mulf %59, %60 : vector<16x128xf32>
    %62 = vector.broadcast %37 : vector<1x128xf32> to vector<16x128xf32>
    %63 = arith.addf %61, %62 : vector<16x128xf32>
    %cst_29 = arith.constant 0.000000e+00 : f32
    %64 = vector.broadcast %cst_29 : f32 to vector<16x128xf32>
    %65 = arith.maximumf %63, %64 : vector<16x128xf32>
    %c0_30 = arith.constant 0 : index
    %c0_31 = arith.constant 0 : index
    %66 = vector.load %arg8[%c0_30, %c0_31] : memref<1x128xf32, #tpu.memory_space<vmem>>, vector<1x128xf32>
    %67 = vector.broadcast %66 : vector<1x128xf32> to vector<16x128xf32>
    %68 = arith.mulf %65, %67 : vector<16x128xf32>
    %cst_32 = arith.constant dense<0.000000e+00> : vector<16xf32>
    %69 = vector.multi_reduction <add>, %68, %cst_32 [1] : vector<16x128xf32> to vector<16xf32>
    %70 = vector.shape_cast %69 : vector<16xf32> to vector<16x1xf32>
    %c0_33 = arith.constant 0 : index
    %71 = memref.load %arg9[%c0_33] : memref<1xf32, #tpu.memory_space<smem>>
    %72 = vector.broadcast %71 : f32 to vector<16x1xf32>
    %73 = arith.addf %70, %72 : vector<16x1xf32>
    %c0_34 = arith.constant 0 : index
    %c0_35 = arith.constant 0 : index
    %74 = vector.load %arg10[%c0_34, %c0_35] : memref<16x1xf32, #tpu.memory_space<vmem>>, vector<16x1xf32>
    tpu.vector_store %arg10[%c0_34, %c0_35], %73 {strides = array<i32>} : memref<16x1xf32, #tpu.memory_space<vmem>>, vector<16x1xf32>,
    return
  }
  func.func @transform_0(%arg0: i32) -> (i32, i32) {
    %c0_i32 = arith.constant 0 : i32
    %c0_i32_0 = arith.constant 0 : i32
    return %arg0, %c0_i32 : i32, i32
  }
  func.func @transform_1(%arg0: i32) -> (i32, i32) {
    %c0_i32 = arith.constant 0 : i32
    %c0_i32_0 = arith.constant 0 : i32
    %c0_i32_1 = arith.constant 0 : i32
    return %c0_i32, %c0_i32_0 : i32, i32
  }
  func.func @transform_2(%arg0: i32) -> (i32, i32) {
    %c0_i32 = arith.constant 0 : i32
    %c0_i32_0 = arith.constant 0 : i32
    %c0_i32_1 = arith.constant 0 : i32
    return %c0_i32, %c0_i32_0 : i32, i32
  }
  func.func @transform_3(%arg0: i32) -> (i32, i32) {
    %c0_i32 = arith.constant 0 : i32
    %c0_i32_0 = arith.constant 0 : i32
    %c0_i32_1 = arith.constant 0 : i32
    return %c0_i32, %c0_i32_0 : i32, i32
  }
  func.func @transform_4(%arg0: i32) -> (i32, i32) {
    %c0_i32 = arith.constant 0 : i32
    %c0_i32_0 = arith.constant 0 : i32
    %c0_i32_1 = arith.constant 0 : i32
    return %c0_i32, %c0_i32_0 : i32, i32
  }
  func.func @transform_5(%arg0: i32) -> (i32, i32) {
    %c0_i32 = arith.constant 0 : i32
    %c0_i32_0 = arith.constant 0 : i32
    %c0_i32_1 = arith.constant 0 : i32
    return %c0_i32, %c0_i32_0 : i32, i32
  }
  func.func @transform_6(%arg0: i32) -> (i32, i32) {
    %c0_i32 = arith.constant 0 : i32
    %c0_i32_0 = arith.constant 0 : i32
    %c0_i32_1 = arith.constant 0 : i32
    return %c0_i32, %c0_i32_0 : i32, i32
  }
  func.func @transform_7(%arg0: i32) -> (i32, i32) {
    %c0_i32 = arith.constant 0 : i32
    %c0_i32_0 = arith.constant 0 : i32
    %c0_i32_1 = arith.constant 0 : i32
    return %c0_i32, %c0_i32_0 : i32, i32
  }
  func.func @transform_8(%arg0: i32) -> i32 {
    %c0_i32 = arith.constant 0 : i32
    %c0_i32_0 = arith.constant 0 : i32
    return %c0_i32 : i32
  }
  func.func @transform_9(%arg0: i32) -> (i32, i32) {
    %c0_i32 = arith.constant 0 : i32
    %c0_i32_0 = arith.constant 0 : i32
    return %arg0, %c0_i32 : i32, i32
  }
}

</mosaic_0001>

<bundles_post_ra>
// kernel: termination_decoder.1
= control target key start
LH: loop header
LB: loop body
LE: loop exit
PB: predicated region body
PF: predicated region fallthrough
CT: control target
= control target key end

     0   :  { %vm336_vm12 = vcmask 7168   ;;  %s571_s1 = inlined_call_operand.vmem [shape: bf16[128,128], index: 1, kind: input, shape index: {}]   ;;  %s572_s0 = inlined_call_operand.vmem [shape: bf16[16,128], index: 0, kind: input, shape index: {}]   ;;  %s573_s2 = inlined_call_operand.vmem [shape: f32[1,128], index: 2, kind: input, shape index: {}]   ;;  %s574_s3 = inlined_call_operand.vmem [shape: f32[1,128], index: 3, kind: input, shape index: {}]   ;;  %s575_s4 = inlined_call_operand.vmem [shape: bf16[128,128], index: 4, kind: input, shape index: {}]   ;;  %s576_s5 = inlined_call_operand.vmem [shape: f32[1,128], index: 5, kind: input, shape index: {}]   ;;  %s577_s6 = inlined_call_operand.vmem [shape: f32[1,128], index: 6, kind: input, shape index: {}]   ;;  %s578_s7 = inlined_call_operand.vmem [shape: f32[1,128], index: 7, kind: input, shape index: {}]   ;;  %s579_s8 = inlined_call_operand.<no memory space> [shape: f32[1], index: 8, kind: input, shape index: {}]   ;;  %s580_s9 = inlined_call_operand.vmem [shape: f32[16,1], index: 9, kind: output, shape index: {}]  }
   0x1   :  { %v419_v0 = vld [vmem:[%s571_s1 + $0x38] sm:$0xff]  ;;  %v418_v1 = vld [vmem:[%s571_s1 + $0x30] sm:$0xff]  ;;  %v417_v2 = vld [vmem:[%s571_s1 + $0x28] sm:$0xff] }
   0x2   :  { %105 = vmatpush.bf16.msra.mxu0 %v419_v0  ;;  %v416_v3 = vld [vmem:[%s571_s1 + $0x20] sm:$0xff]  ;;  %v415_v4 = vld [vmem:[%s571_s1 + $0x18] sm:$0xff]  ;;  %v414_v5 = vld [vmem:[%s571_s1 + $0x10] sm:$0xff] }
   0x3   :  { %v413_v6 = vld [vmem:[%s571_s1 + $0x8] sm:$0xff]  ;;  %v412_v7 = vld [vmem:[%s571_s1] sm:$0xff]  ;;  %v427_v19 = vld [vmem:[%s575_s4 + $0x38] sm:$0xff] }
   0x4   :  { %v411_v8 = vld [vmem:[%s572_s0] sm:$0xff]  ;;  %246 = vmatpush.bf16.msra.mxu1 %v427_v19  ;;  %v426_v20 = vld [vmem:[%s575_s4 + $0x30] sm:$0xff]  ;;  %v425_v21 = vld [vmem:[%s575_s4 + $0x28] sm:$0xff] }
   0x5   :  { %v424_v22 = vld [vmem:[%s575_s4 + $0x20] sm:$0xff]  ;;  %v423_v24 = vld [vmem:[%s575_s4 + $0x18] sm:$0xff]  ;;  %v422_v27 = vld [vmem:[%s575_s4 + $0x10] sm:$0xff] }
   0x6   :  { %106 = vmatpush.bf16.msra.mxu0 %v418_v1  ;;  %v421_v29 = vld [vmem:[%s575_s4 + $0x8] sm:$0xff]  ;;  %v420_v33 = vld [vmem:[%s575_s4] sm:$0xff] }
   0x7   :  { %v428_v53 = vld [vmem:[%s573_s2] ss:$0 sm:$0xff] }
   0x8   :  { %247 = vmatpush.bf16.msra.mxu1 %v426_v20  ;;  %v429_v57 = vld [vmem:[%s574_s3] ss:$0 sm:$0xff] }
   0xa   :  { %107 = vmatpush.bf16.msra.mxu0 %v417_v2 }
   0xc   :  { %248 = vmatpush.bf16.msra.mxu1 %v425_v21 }
   0xe   :  { %108 = vmatpush.bf16.msra.mxu0 %v416_v3 }
  0x10   :  { %249 = vmatpush.bf16.msra.mxu1 %v424_v22 }
  0x12   :  { %109 = vmatpush.bf16.msra.mxu0 %v415_v4 }
  0x14   :  { %250 = vmatpush.bf16.msra.mxu1 %v423_v24 }
  0x16   :  { %110 = vmatpush.bf16.msra.mxu0 %v414_v5 }
  0x18   :  { %251 = vmatpush.bf16.msra.mxu1 %v422_v27 }
  0x1a   :  { %111 = vmatpush.bf16.msra.mxu0 %v413_v6 }
  0x1c   :  { %252 = vmatpush.bf16.msra.mxu1 %v421_v29 }
  0x1e   :  { %112 = vmatpush.bf16.msra.mxu0 %v412_v7 }
  0x20   :  { %253 = vmatpush.bf16.msra.mxu1 %v420_v33 }
  0x21   :  { %113 = vmatmul.bf16.vlgmr.msra.gmra.mxu0 %v411_v8 }
  0x9e   :  { %v114_v9 = vpop.f32.mrf.mxu0 }
  0x9f   :  { %121 = vadd.xlane.f32.xlu0 %v114_v9 }
  0xa6   :  { %v116_v10 = vpop.f32.mrf.mxu0 }
  0xa7   :  { %123 = vadd.xlane.f32.xlu0 %v116_v10 }
 0x112   :  { %v122_v11 = vpop.xlane.xlu0 %121 }
 0x113   :  { %v125_v12 = vmul.f32 0.03125, %v122_v11 }
 0x115   :  { %v127_v13 = vsub.f32 %v114_v9, %v125_v12  ;;  %v135_v23 = vmul.f32 %v125_v12, %v125_v12 }
 0x117   :  { %v129_v14 = vmul.f32 %v127_v13, %v127_v13  ;;  %v137_v25 = vmul.f32 96.0, %v135_v23 }
 0x119   :  { %131 = vadd.xlane.f32.xlu1 %v129_v14 }
 0x11a   :  { %v124_v15 = vpop.xlane.xlu0 %123 }
 0x11b   :  { %v126_v16 = vmul.f32 0.03125, %v124_v15 }
 0x11d   :  { %v518_v17 = vsub.f32 %v116_v10, %v126_v16  ;;  %v136_v30 = vmul.f32 %v126_v16, %v126_v16 }
 0x11f   :  { %v130_v18 = vmul.f32 %v518_v17, %v518_v17  ;;  %v138_v35 = vmul.f32 96.0, %v136_v30 }
 0x121   :  { %133 = vadd.xlane.f32.xlu1 %v130_v18 }
 0x18c   :  { %v132_v26 = vpop.xlane.xlu1 %131 }
 0x18d   :  { %v139_v28 = vsub.f32 %v132_v26, %v137_v25 }
 0x18f   :  { %v141_v31 = vmul.f32 0.03125, %v139_v28 }
 0x191   :  { %v143_v32 = vmax.f32 %v141_v31, 0.0 }
 0x193   :  { %v145_v34 = vadd.f32 1e-05, %v143_v32 }
 0x194   :  { %v134_v36 = vpop.xlane.xlu1 %133 }
 0x195   :  { %433 = vrsqrt.f32 %v145_v34  ;;  %v140_v37 = vsub.f32 %v134_v36, %v138_v35  ;;  %vm153_vm1 = vweird.f32 %v145_v34 }
 0x197   :  { %v142_v38 = vmul.f32 0.03125, %v140_v37 }
 0x199   :  { %v144_v39 = vmax.f32 %v142_v38, 0.0  ;;  %v431_v38 = vld [vmem:[%s577_s6] ss:$0 sm:$0xff] }
 0x19b   :  { %v434_v40 = vpop.eup %433  ;;  %v146_v41 = vadd.f32 1e-05, %v144_v39 }
 0x19c   :  { %v148_v42 = vmul.f32 %v434_v40, %v145_v34  ;;  %vm154_vm0 = vweird.f32 %v434_v40  ;;  %v430_v34 = vld [vmem:[%s576_s5] ss:$0 sm:$0xff] }
 0x19d   :  { %435 = vrsqrt.f32 %v146_v41  ;;  %vm155_vm2 = vmor %vm153_vm1, %vm154_vm0  ;;  %vm163_vm4 = vweird.f32 %v146_v41 }
 0x19e   :  { %v149_v43 = vmul.f32 %v434_v40, %v148_v42 }
 0x1a0   :  { %v150_v44 = vmul.f32 0.5, %v149_v43  ;;  %v432_v43 = vld [vmem:[%s578_s7] ss:$0 sm:$0xff] }
 0x1a2   :  { %v151_v45 = vsub.f32 1.5, %v150_v44 }
 0x1a3   :  { %v436_v46 = vpop.eup %435 }
 0x1a4   :  { %v152_v47 = vmul.f32 %v434_v40, %v151_v45  ;;  %v158_v48 = vmul.f32 %v436_v46, %v146_v41  ;;  %vm164_vm3 = vweird.f32 %v436_v46 }
 0x1a5   :  { %vm165_vm5 = vmor %vm163_vm4, %vm164_vm3 }
 0x1a6   :  { %v159_v49 = vmul.f32 %v436_v46, %v158_v48  ;;  %v156_v50 = vsel %vm155_vm2, %v434_v40, %v152_v47 }
 0x1a7   :  { %v167_v52 = vmul.f32 %v156_v50, %v127_v13 }
 0x1a8   :  { %v160_v51 = vmul.f32 0.5, %v159_v49 }
 0x1a9   :  { %v172_v56 = vmul.f32 %v428_v53, %v167_v52 }
 0x1aa   :  { %v161_v54 = vsub.f32 1.5, %v160_v51 }
 0x1ab   :  { %v177_v61 = vadd.f32 %v429_v57, %v172_v56 }
 0x1ac   :  { %v162_v55 = vmul.f32 %v436_v46, %v161_v54 }
 0x1ad   :  { %v179_v63 = vmax.f32 %v177_v61, 0.0 }
 0x1ae   :  { %v166_v58 = vsel %vm165_vm5, %v436_v46, %v162_v55 }
 0x1af   :  { %v168_v59 = vmul.f32 %v166_v58, %v518_v17 }
 0x1b1   :  { %v173_v60 = vmul.f32 %v428_v53, %v168_v59  ;;  %v333_v53 = vstv %s579_s8 }
 0x1b3   :  { %v178_v62 = vadd.f32 %v429_v57, %v173_v60 }
 0x1b5   :  { %v180_v0 = vmax.f32 %v178_v62, 0.0 }
 0x1b7   :  { %v181_v1 = vpack.c.bf16 %v180_v0, %v179_v63 }
 0x1b9   :  { %254 = vmatmul.bf16.vlgmr.msra.gmra.mxu1 %v181_v1 }
 0x236   :  { %v255_v2 = vpop.f32.mrf.mxu1 }
 0x237   :  { %262 = vadd.xlane.f32.xlu2 %v255_v2 }
 0x23e   :  { %v257_v3 = vpop.f32.mrf.mxu1 }
 0x23f   :  { %264 = vadd.xlane.f32.xlu2 %v257_v3 }
 0x2aa   :  { %v263_v4 = vpop.xlane.xlu2 %262 }
 0x2ab   :  { %v266_v5 = vmul.f32 0.03125, %v263_v4 }
 0x2ad   :  { %v268_v6 = vsub.f32 %v255_v2, %v266_v5  ;;  %v276_v12 = vmul.f32 %v266_v5, %v266_v5 }
 0x2af   :  { %v270_v7 = vmul.f32 %v268_v6, %v268_v6  ;;  %v278_v13 = vmul.f32 96.0, %v276_v12 }
 0x2b1   :  { %272 = vadd.xlane.f32.xlu0 %v270_v7 }
 0x2b2   :  { %v265_v8 = vpop.xlane.xlu2 %264 }
 0x2b3   :  { %v267_v9 = vmul.f32 0.03125, %v265_v8 }
 0x2b5   :  { %v269_v10 = vsub.f32 %v257_v3, %v267_v9  ;;  %v277_v16 = vmul.f32 %v267_v9, %v267_v9 }
 0x2b7   :  { %v271_v11 = vmul.f32 %v269_v10, %v269_v10  ;;  %v279_v20 = vmul.f32 96.0, %v277_v16 }
 0x2b9   :  { %274 = vadd.xlane.f32.xlu1 %v271_v11 }
 0x324   :  { %v273_v14 = vpop.xlane.xlu0 %272 }
 0x325   :  { %v280_v15 = vsub.f32 %v273_v14, %v278_v13 }
 0x327   :  { %v282_v17 = vmul.f32 0.03125, %v280_v15 }
 0x329   :  { %v284_v18 = vmax.f32 %v282_v17, 0.0 }
 0x32b   :  { %v286_v19 = vadd.f32 1e-05, %v284_v18 }
 0x32c   :  { %v275_v21 = vpop.xlane.xlu1 %274 }
 0x32d   :  { %437 = vrsqrt.f32 %v286_v19  ;;  %v281_v22 = vsub.f32 %v275_v21, %v279_v20  ;;  %vm294_vm7 = vweird.f32 %v286_v19 }
 0x32f   :  { %v283_v23 = vmul.f32 0.03125, %v281_v22 }
 0x331   :  { %v285_v24 = vmax.f32 %v283_v23, 0.0 }
 0x333   :  { %v438_v25 = vpop.eup %437  ;;  %v287_v26 = vadd.f32 1e-05, %v285_v24 }
 0x334   :  { %v289_v27 = vmul.f32 %v438_v25, %v286_v19  ;;  %vm295_vm6 = vweird.f32 %v438_v25 }
 0x335   :  { %439 = vrsqrt.f32 %v287_v26  ;;  %vm296_vm8 = vmor %vm294_vm7, %vm295_vm6  ;;  %vm304_vm10 = vweird.f32 %v287_v26 }
 0x336   :  { %v290_v28 = vmul.f32 %v438_v25, %v289_v27 }
 0x338   :  { %v291_v29 = vmul.f32 0.5, %v290_v28 }
 0x33a   :  { %v292_v30 = vsub.f32 1.5, %v291_v29 }
 0x33b   :  { %v440_v31 = vpop.eup %439 }
 0x33c   :  { %v293_v32 = vmul.f32 %v438_v25, %v292_v30  ;;  %v299_v33 = vmul.f32 %v440_v31, %v287_v26  ;;  %vm305_vm9 = vweird.f32 %v440_v31 }
 0x33d   :  { %vm306_vm11 = vmor %vm304_vm10, %vm305_vm9 }
 0x33e   :  { %v300_v35 = vmul.f32 %v440_v31, %v299_v33  ;;  %v297_v36 = vsel %vm296_vm8, %v438_v25, %v293_v32 }
 0x33f   :  { %v308_v37 = vmul.f32 %v297_v36, %v268_v6 }
 0x340   :  { %v301_v39 = vmul.f32 0.5, %v300_v35 }
 0x341   :  { %v313_v40 = vmul.f32 %v430_v34, %v308_v37 }
 0x342   :  { %v302_v41 = vsub.f32 1.5, %v301_v39 }
 0x343   :  { %v318_v42 = vadd.f32 %v431_v38, %v313_v40 }
 0x344   :  { %v303_v44 = vmul.f32 %v440_v31, %v302_v41 }
 0x345   :  { %v320_v45 = vmax.f32 %v318_v42, 0.0 }
 0x346   :  { %v307_v46 = vsel %vm306_vm11, %v440_v31, %v303_v44 }
 0x347   :  { %v326_v47 = vmul.f32 %v432_v43, %v320_v45  ;;  %v309_v48 = vmul.f32 %v307_v46, %v269_v10 }
 0x349   :  { %328 = vadd.xlane.f32.xlu2 %v326_v47  ;;  %v314_v49 = vmul.f32 %v430_v34, %v309_v48 }
 0x34b   :  { %v319_v50 = vadd.f32 %v431_v38, %v314_v49 }
 0x34d   :  { %v321_v51 = vmax.f32 %v319_v50, 0.0 }
 0x34f   :  { %v327_v52 = vmul.f32 %v432_v43, %v321_v51 }
 0x351   :  { %330 = vadd.xlane.f32.xlu0 %v327_v52 }
 0x3bc   :  { %v329_v54 = vpop.xlane.xlu2 %328 }
 0x3bd   :  { %v334_v55 = vadd.f32 %v333_v53, %v329_v54 }
 0x3bf   :  { %337 = vst.msk [vmem:[%s580_s9] sm:$0xff] %vm336_vm12, %v334_v55 }
 0x3c4   :  { %v331_v56 = vpop.xlane.xlu0 %330 }
 0x3c5   :  { %v335_v57 = vadd.f32 %v333_v53, %v331_v56 }
 0x3c7   :  { %338 = vst.msk [vmem:[%s580_s9 + $0x8] sm:$0xff] %vm336_vm12, %v335_v57 }

</bundles_post_ra>
